<compile_context>
chip_gen: v7x
topology: tpu7x:2x2x1
jax: 0.10.0
libtpu: 0.0.40
codegen_flags: <defaults>
</compile_context>

<pallas_src>
import functools

import jax
import jax.numpy as jnp
from jax.experimental import pallas as pl
from jax.experimental.pallas import tpu as pltpu

IN_FEATS = 7
H0, H1, H2 = 32, 32, 96          # hidden_dims
P = 3                            # capsules per layer
K = 2                            # polynomial order
OUT_FEATS = 256
BN_EPS = 1e-5
LEAKY_SLOPE = 0.01

D1 = H1 * P                      # 96   true primary-capsule width
D2 = H2 * P                      # 288  true secondary-capsule width
D1P = 128                        # lane-padded primary width (= per-head pad of caps2)
D2P = P * D1P                    # 384  lane-padded secondary width (3 head blocks)

# the repeat(1,3)+residual-as-lane-aligned-adds trick needs c1 width == per-head width
assert D1 == H2


# --------------------------------------------------------------------------- #
# helpers
# --------------------------------------------------------------------------- #
def _round_up(x, m):
    return (x + m - 1) // m * m


def _vmem_limit_bytes():
    """Generation-aware scoped-VMEM limit (falls back to 48 MiB if query fails)."""
    try:
        cap = int(pltpu.get_tpu_info().vmem_capacity_bytes)
    except Exception:
        cap = 64 * 1024 * 1024
    return max(32 * 1024 * 1024, min(96 * 1024 * 1024, cap * 3 // 4))


def _prep_weights(params):
    """Lane-pad weights. caps2 columns are laid out as three 128-lane head blocks
    (head h -> lanes [h*128, h*128+96)); padded rows/cols are zero, so exact."""
    f32, bf16 = jnp.float32, jnp.bfloat16
    wc1p = jnp.zeros((K * H0, D1P), f32).at[:, :D1].set(params["wc1"]).astype(bf16)
    bc1p = jnp.zeros((1, D1P), f32).at[:, :D1].set(params["bc1"])
    wc2p = jnp.zeros((K * D1P, D2P), f32)
    bc2p = jnp.zeros((1, D2P), f32)
    w2p = jnp.zeros((D2P, OUT_FEATS), f32)
    for hh in range(P):
        src = slice(hh * H2, (hh + 1) * H2)          # true columns of this head
        dst = slice(hh * D1P, hh * D1P + H2)         # padded lanes of this head
        wc2p = wc2p.at[0:D1, dst].set(params["wc2"][0:D1, src])
        wc2p = wc2p.at[D1P:D1P + D1, dst].set(params["wc2"][D1:2 * D1, src])
        bc2p = bc2p.at[:, dst].set(params["bc2"][:, src])
        w2p = w2p.at[dst, :].set(params["w2"][src, :])
    return wc1p, bc1p, wc2p.astype(bf16), bc2p, w2p


def _pad_inputs(X, L, params, n_pad):
    """linear1 runs once in plain XLA; h and L are zero-padded bf16 (inert padding)."""
    f32, bf16 = jnp.float32, jnp.bfloat16
    N = X.shape[0]
    h = X.astype(f32) @ params["w1"] + params["b1"]
    hp = jnp.zeros((n_pad, H0), f32).at[:N].set(h).astype(bf16)
    Lp = jnp.zeros((n_pad, n_pad), f32).at[:N, :N].set(L.astype(f32)).astype(bf16)
    return hp, Lp


# --------------------------------------------------------------------------- #
# kernels
# --------------------------------------------------------------------------- #
def _caps1_kernel(hf_ref, l_ref, wc1_ref, bc1_ref, c1_ref, *, tm, single_tile):
    """Primary_Capsule for one node tile. h is a precomputed bf16 const; the tile
    is a 16-aligned slice of it (no duplicate DMA stream). Output bf16 [TM,128]."""
    if single_tile:
        h_tile = hf_ref[...]
    else:
        i = pl.program_id(0)
        h_tile = hf_ref[pl.ds(pl.multiple_of(i * tm, tm), tm), :]
    # O(N^2) graph conv, bf16 operands, f32 accumulation.
    lh = jnp.dot(l_ref[...], hf_ref[...], preferred_element_type=jnp.float32)   # [TM,32]
    c1 = (jnp.dot(h_tile, wc1_ref[0:H0], preferred_element_type=jnp.float32)
          + jnp.dot(lh.astype(jnp.bfloat16), wc1_ref[H0:2 * H0],
                    preferred_element_type=jnp.float32)
          + bc1_ref[...])
    c1_ref[...] = jnp.maximum(c1, 0.0).astype(c1_ref.dtype)                     # ReLU, bf16


def _caps2_kernel(c1f_ref, l_ref, wc2_ref, bc2_ref, xc_ref, sum_ref, ssq_ref,
                  *, tm, n_valid, single_tile):
    """Secondary_Capsule + residual (lane-aligned adds) + per-tile BN statistics."""
    i = pl.program_id(0)
    if single_tile:
        c1t = c1f_ref[...]
    else:
        c1t = c1f_ref[pl.ds(pl.multiple_of(i * tm, tm), tm), :]                 # bf16 [TM,128]
    lc1 = jnp.dot(l_ref[...], c1f_ref[...], preferred_element_type=jnp.float32)  # [TM,128]
    c2 = (jnp.dot(c1t, wc2_ref[0:D1P], preferred_element_type=jnp.float32)
          + jnp.dot(lc1.astype(jnp.bfloat16), wc2_ref[D1P:2 * D1P],
                    preferred_element_type=jnp.float32)
          + bc2_ref[...])
    c2 = jnp.maximum(c2, 0.0)                                                   # [TM,384]
    # residual x_caps1.repeat(1,3) + x_caps2 : three 128-lane-aligned adds (no matmul)
    c1f32 = c1t.astype(jnp.float32)
    xc = c2 + jnp.concatenate([c1f32] * P, axis=1)                              # [TM,384]
    xc_ref[...] = xc.astype(xc_ref.dtype)                                       # bf16 store
    # masked one-pass BN statistics (padded rows excluded), computed in f32
    rows = i * tm + jax.lax.broadcasted_iota(jnp.int32, (tm, 1), 0)
    mask = (rows < n_valid).astype(jnp.float32)
    xm = xc * mask
    sum_ref[...] = jnp.broadcast_to(jnp.sum(xm, axis=0, keepdims=True), sum_ref.shape)
    ssq_ref[...] = jnp.broadcast_to(jnp.sum(xm * xc, axis=0, keepdims=True), ssq_ref.shape)


def _head_kernel(xc_ref, w2_ref, b2_ref, o_ref):
    """BN folded into linear2 (scaled weights / shifted bias) + LeakyReLU."""
    x = xc_ref[...].astype(jnp.float32)
    y = jnp.dot(x, w2_ref[...], preferred_element_type=jnp.float32) + b2_ref[...]
    o_ref[...] = jnp.where(y > 0, y, LEAKY_SLOPE * y).astype(o_ref.dtype)


def _fused_kernel(hf_ref, l_ref, wc1_ref, bc1_ref, wc2_ref, bc2_ref, w2_ref, b2_ref,
                  o_ref, *, n_valid):
    """Single-launch fast path for small graphs: both capsules, residual, in-kernel
    BatchNorm (batch stats), linear2 and LeakyReLU; no intermediate HBM traffic."""
    h = hf_ref[...]                                                             # bf16 [Np,32]
    lmat = l_ref[...]                                                           # bf16 [Np,Np]
    lh = jnp.dot(lmat, h, preferred_element_type=jnp.float32)
    c1 = jnp.maximum(
        jnp.dot(h, wc1_ref[0:H0], preferred_element_type=jnp.float32)
        + jnp.dot(lh.astype(jnp.bfloat16), wc1_ref[H0:2 * H0],
                  preferred_element_type=jnp.float32)
        + bc1_ref[...], 0.0)
    c1b = c1.astype(jnp.bfloat16)
    lc1 = jnp.dot(lmat, c1b, preferred_element_type=jnp.float32)
    c2 = jnp.maximum(
        jnp.dot(c1b, wc2_ref[0:D1P], preferred_element_type=jnp.float32)
        + jnp.dot(lc1.astype(jnp.bfloat16), wc2_ref[D1P:2 * D1P],
                  preferred_element_type=jnp.float32)
        + bc2_ref[...], 0.0)
    c1f32 = c1b.astype(jnp.float32)
    xc = c2 + jnp.concatenate([c1f32] * P, axis=1)                              # [Np,384]
    rows = jax.lax.broadcasted_iota(jnp.int32, (xc.shape[0], 1), 0)
    mask = (rows < n_valid).astype(jnp.float32)
    xm = xc * mask
    inv_n = 1.0 / float(n_valid)
    mean = jnp.sum(xm, axis=0, keepdims=True) * inv_n
    var = jnp.maximum(jnp.sum(xm * xc, axis=0, keepdims=True) * inv_n - mean * mean, 0.0)
    scale = jax.lax.rsqrt(var + BN_EPS)
    # mirror the tiled path's bf16 xcaps storage so both paths agree bit-for-bit-ish
    xn = (xc.astype(jnp.bfloat16).astype(jnp.float32) - mean) * scale
    y = jnp.dot(xn, w2_ref[...], preferred_element_type=jnp.float32) + b2_ref[...]
    o_ref[...] = jnp.where(y > 0, y, LEAKY_SLOPE * y).astype(o_ref.dtype)


# --------------------------------------------------------------------------- #
# wrappers
# --------------------------------------------------------------------------- #
def _encode_fused(X, L, params):
    N = X.shape[0]
    Np = _round_up(max(N, 1), 8)
    hp, Lp = _pad_inputs(X, L, params, Np)
    wc1p, bc1p, wc2p, bc2p, w2p = _prep_weights(params)
    y = pl.pallas_call(
        functools.partial(_fused_kernel, n_valid=N),
        out_shape=jax.ShapeDtypeStruct((Np, OUT_FEATS), jnp.float32),
        compiler_params=pltpu.CompilerParams(vmem_limit_bytes=_vmem_limit_bytes()),
    )(hp, Lp, wc1p, bc1p, wc2p, bc2p, w2p, params["b2"])
    return y[:N]


def _encode_tiled(X, L, params):
    N = X.shape[0]
    f32, bf16 = jnp.float32, jnp.bfloat16
    # node-tile size: keep both TensorCores busy; tiles 16-aligned for bf16 slices
    if N <= 16:
        TM = _round_up(max(N, 1), 8)
    elif N <= 512:
        TM = _round_up(N, 32) // 2
    else:
        TM = 512
    Np = _round_up(N, TM)
    G = Np // TM

    hp, Lp = _pad_inputs(X, L, params, Np)
    wc1p, bc1p, wc2p, bc2p, w2p = _prep_weights(params)

    cparams = pltpu.CompilerParams(
        dimension_semantics=("parallel",),
        vmem_limit_bytes=_vmem_limit_bytes(),
    )

    def const_spec(shape):
        return pl.BlockSpec(shape, lambda i: (0, 0))       # VMEM-resident, loaded once

    def row_spec(width):
        return pl.BlockSpec((TM, width), lambda i: (i, 0))

    # ---- pass 1: Primary_Capsule (h precomputed outside) ------------------------
    c1p = pl.pallas_call(
        functools.partial(_caps1_kernel, tm=TM, single_tile=(G == 1)),
        out_shape=jax.ShapeDtypeStruct((Np, D1P), bf16),
        grid=(G,),
        in_specs=[const_spec((Np, H0)),                     # full h (bf16, for L @ h)
                  row_spec(Np),                             # L row panel (bf16)
                  const_spec((K * H0, D1P)),
                  const_spec((1, D1P))],
        out_specs=row_spec(D1P),
        compiler_params=cparams,
    )(hp, Lp, wc1p, bc1p)

    # ---- pass 2: Secondary_Capsule + residual + BN partial stats ----------------
    xcaps, sums, ssqs = pl.pallas_call(
        functools.partial(_caps2_kernel, tm=TM, n_valid=N, single_tile=(G == 1)),
        out_shape=(jax.ShapeDtypeStruct((Np, D2P), bf16),
                   jax.ShapeDtypeStruct((G * 8, D2P), f32),
                   jax.ShapeDtypeStruct((G * 8, D2P), f32)),
        grid=(G,),
        in_specs=[const_spec((Np, D1P)),                    # full c1 (bf16, for L @ c1)
                  row_spec(Np),                             # L row panel (bf16)
                  const_spec((K * D1P, D2P)),
                  const_spec((1, D2P))],
        out_specs=(row_spec(D2P),
                   pl.BlockSpec((8, D2P), lambda i: (i, 0)),
                   pl.BlockSpec((8, D2P), lambda i: (i, 0))),
        compiler_params=cparams,
    )(c1p, Lp, wc2p, bc2p)

    # ---- fold BatchNorm (affine=False, biased batch stats) into linear2 ---------
    total = sums.reshape(G, 8, D2P)[:, 0, :].sum(axis=0)    # [384]
    totsq = ssqs.reshape(G, 8, D2P)[:, 0, :].sum(axis=0)    # [384]
    mean = total / N
    var = jnp.maximum(totsq / N - mean * mean, 0.0)
    scale = jax.lax.rsqrt(var + BN_EPS)
    w2f = w2p * scale[:, None]                              # [384,256] (kept f32)
    b2f = params["b2"] - (mean * scale)[None, :] @ w2p      # [1,256]

    # ---- pass 3: folded BN + linear2 + LeakyReLU --------------------------------
    y = pl.pallas_call(
        _head_kernel,
        out_shape=jax.ShapeDtypeStruct((Np, OUT_FEATS), f32),
        grid=(G,),
        in_specs=[row_spec(D2P),
                  const_spec((D2P, OUT_FEATS)),
                  const_spec((1, OUT_FEATS))],
        out_specs=row_spec(OUT_FEATS),
        compiler_params=cparams,
    )(xcaps, w2f, b2f)

    return y[:N]


def task_graph_encoder(X, L, params, *, fused_threshold=2048):
    """Task_Graph_Encoder forward. Small graphs take the single fused kernel;
    larger graphs take the 3-pass node-tiled pipeline."""
    N = X.shape[0]
    if N <= fused_threshold:
        return _encode_fused(X, L, params)
    return _encode_tiled(X, L, params)


# --------------------------------------------------------------------------- #
# params + pure-JAX reference
# --------------------------------------------------------------------------- #
def init_params(key):
    ks = jax.random.split(key, 10)

    def lin(k, fan_in, shape):
        bound = 1.0 / jnp.sqrt(fan_in)
        return jax.random.uniform(k, shape, jnp.float32, -bound, bound)

    return {
        "w1":  lin(ks[0], IN_FEATS, (IN_FEATS, H0)),
        "b1":  lin(ks[1], IN_FEATS, (1, H0)),
        "wc1": lin(ks[2], K * H0,   (K * H0, D1)),     # [64, 96]
        "bc1": lin(ks[3], K * H0,   (1, D1)),
        "wc2": lin(ks[4], K * D1,   (K * D1, D2)),     # [192, 288]
        "bc2": lin(ks[5], K * D1,   (1, D2)),
        "w2":  lin(ks[6], D2,       (D2, OUT_FEATS)),
        "b2":  lin(ks[7], D2,       (1, OUT_FEATS)),
    }


def reference_forward(X, L, p):
    """Pure-JAX mirror of the PyTorch forward, using the kernels' mixed-precision
    policy (bf16 L / h / c1 / capsule weights / xcaps storage, f32 accumulation)."""
    f32, bf16 = jnp.float32, jnp.bfloat16
    Lb = L.astype(bf16)
    h = (X @ p["w1"] + p["b1"]).astype(bf16)
    lh = jnp.dot(Lb, h, preferred_element_type=f32)
    c1 = jax.nn.relu(
        jnp.dot(h, p["wc1"][:H0].astype(bf16), preferred_element_type=f32)
        + jnp.dot(lh.astype(bf16), p["wc1"][H0:].astype(bf16), preferred_element_type=f32)
        + p["bc1"]).astype(bf16)
    lc1 = jnp.dot(Lb, c1, preferred_element_type=f32)
    c2 = jax.nn.relu(
        jnp.dot(c1, p["wc2"][:D1].astype(bf16), preferred_element_type=f32)
        + jnp.dot(lc1.astype(bf16), p["wc2"][D1:].astype(bf16), preferred_element_type=f32)
        + p["bc2"])
    xcaps = jnp.tile(c1.astype(f32), (1, P)) + c2
    mean = xcaps.mean(0, keepdims=True)
    var = ((xcaps - mean) ** 2).mean(0, keepdims=True)      # biased (BN training mode)
    xcb = xcaps.astype(bf16).astype(f32)                     # kernels store xcaps in bf16
    xn = (xcb - mean) * jax.lax.rsqrt(var + BN_EPS)
    y = xn @ p["w2"] + p["b2"]
    return jnp.where(y > 0, y, LEAKY_SLOPE * y)


# --------------------------------------------------------------------------- #
if __name__ == "__main__":
    key = jax.random.PRNGKey(0)
    k_x, k_p = jax.random.split(key)

    N = 8  # number of graph nodes
    X = jax.random.normal(k_x, (N, IN_FEATS), jnp.float32)

    # Deterministic ring-graph Laplacian L = I - D^{-1/2} A D^{-1/2}
    idx = jnp.arange(N)
    A = (jnp.zeros((N, N))
         .at[idx, (idx + 1) % N].set(1.0)
         .at[(idx + 1) % N, idx].set(1.0))
    deg = A.sum(1)
    dinv = 1.0 / jnp.sqrt(deg)
    L = (jnp.eye(N) - dinv[:, None] * A * dinv[None, :]).astype(jnp.float32)

    params = init_params(k_p)
    ref = reference_forward(X, L, params)

    # exercise both code paths: the fused small-graph kernel and the tiled pipeline
    encode_fused = jax.jit(functools.partial(task_graph_encoder, fused_threshold=4096))
    encode_tiled = jax.jit(functools.partial(task_graph_encoder, fused_threshold=0))

    out_fused = jax.block_until_ready(encode_fused(X, L, params))
    out_tiled = jax.block_until_ready(encode_tiled(X, L, params))

    assert out_fused.shape == (N, OUT_FEATS)
    assert out_tiled.shape == (N, OUT_FEATS)
    err_f = float(jnp.max(jnp.abs(out_fused - ref)))
    err_t = float(jnp.max(jnp.abs(out_tiled - ref)))
    assert jnp.allclose(out_fused, ref, atol=5e-3, rtol=5e-3), \
        f"fused path mismatch vs reference (max err {err_f})"
    assert jnp.allclose(out_tiled, ref, atol=5e-3, rtol=5e-3), \
        f"tiled path mismatch vs reference (max err {err_t})"

    print("KERNEL_OK")
</pallas_src>

<mosaic_0001>
module attributes {stable_mosaic.version = 11 : i64} {
  func.func @_fused_kernel(%arg0: memref<8x32xbf16, #tpu.memory_space<vmem>>, %arg1: memref<8x8xbf16, #tpu.memory_space<vmem>>, %arg2: memref<64x128xbf16, #tpu.memory_space<vmem>>, %arg3: memref<1x128xf32, #tpu.memory_space<vmem>>, %arg4: memref<256x384xbf16, #tpu.memory_space<vmem>>, %arg5: memref<1x384xf32, #tpu.memory_space<vmem>>, %arg6: memref<384x256xf32, #tpu.memory_space<vmem>>, %arg7: memref<1x256xf32, #tpu.memory_space<vmem>>, %arg8: memref<8x256xf32, #tpu.memory_space<vmem>>) attributes {dimension_semantics = [], scalar_prefetch = 0 : i64, scratch_operands = 0 : i64, tpu.core_type = #tpu.core_type<tc>} {
    %c0 = arith.constant 0 : index
    %c0_0 = arith.constant 0 : index
    %0 = vector.load %arg0[%c0, %c0_0] : memref<8x32xbf16, #tpu.memory_space<vmem>>, vector<8x32xbf16>
    %c0_1 = arith.constant 0 : index
    %c0_2 = arith.constant 0 : index
    %1 = vector.load %arg1[%c0_1, %c0_2] : memref<8x8xbf16, #tpu.memory_space<vmem>>, vector<8x8xbf16>
    %cst = arith.constant dense<0.000000e+00> : vector<8x32xf32>
    %2 = tpu.matmul %1, %0, %cst {dimension_numbers = #tpu.dot_dimension_numbers<[1], [0], [0], [1], [0, 0, 1, 1], [], []>} : vector<8x8xbf16>, vector<8x32xbf16>, vector<8x32xf32> -> vector<8x32xf32>
    %c0_3 = arith.constant 0 : index
    %c0_4 = arith.constant 0 : index
    %3 = vector.load %arg2[%c0_3, %c0_4] : memref<64x128xbf16, #tpu.memory_space<vmem>>, vector<32x128xbf16>
    %cst_5 = arith.constant dense<0.000000e+00> : vector<8x128xf32>
    %4 = tpu.matmul %0, %3, %cst_5 {dimension_numbers = #tpu.dot_dimension_numbers<[1], [0], [0], [1], [0, 0, 1, 1], [], []>} : vector<8x32xbf16>, vector<32x128xbf16>, vector<8x128xf32> -> vector<8x128xf32>
    %5 = arith.truncf %2 : vector<8x32xf32> to vector<8x32xbf16>
    %c32 = arith.constant 32 : index
    %c0_6 = arith.constant 0 : index
    %6 = vector.load %arg2[%c32, %c0_6] : memref<64x128xbf16, #tpu.memory_space<vmem>>, vector<32x128xbf16>
    %cst_7 = arith.constant dense<0.000000e+00> : vector<8x128xf32>
    %7 = tpu.matmul %5, %6, %cst_7 {dimension_numbers = #tpu.dot_dimension_numbers<[1], [0], [0], [1], [0, 0, 1, 1], [], []>} : vector<8x32xbf16>, vector<32x128xbf16>, vector<8x128xf32> -> vector<8x128xf32>
    %8 = arith.addf %4, %7 : vector<8x128xf32>
    %c0_8 = arith.constant 0 : index
    %c0_9 = arith.constant 0 : index
    %9 = vector.load %arg3[%c0_8, %c0_9] : memref<1x128xf32, #tpu.memory_space<vmem>>, vector<1x128xf32>
    %10 = vector.broadcast %9 : vector<1x128xf32> to vector<8x128xf32>
    %11 = arith.addf %8, %10 : vector<8x128xf32>
    %cst_10 = arith.constant 0.000000e+00 : f32
    %12 = vector.broadcast %cst_10 : f32 to vector<8x128xf32>
    %13 = arith.maximumf %11, %12 : vector<8x128xf32>
    %14 = arith.truncf %13 : vector<8x128xf32> to vector<8x128xbf16>
    %cst_11 = arith.constant dense<0.000000e+00> : vector<8x128xf32>
    %15 = tpu.matmul %1, %14, %cst_11 {dimension_numbers = #tpu.dot_dimension_numbers<[1], [0], [0], [1], [0, 0, 1, 1], [], []>} : vector<8x8xbf16>, vector<8x128xbf16>, vector<8x128xf32> -> vector<8x128xf32>
    %c0_12 = arith.constant 0 : index
    %c0_13 = arith.constant 0 : index
    %16 = vector.load %arg4[%c0_12, %c0_13] : memref<256x384xbf16, #tpu.memory_space<vmem>>, vector<128x384xbf16>
    %cst_14 = arith.constant dense<0.000000e+00> : vector<8x384xf32>
    %17 = tpu.matmul %14, %16, %cst_14 {dimension_numbers = #tpu.dot_dimension_numbers<[1], [0], [0], [1], [0, 0, 1, 1], [], []>} : vector<8x128xbf16>, vector<128x384xbf16>, vector<8x384xf32> -> vector<8x384xf32>
    %18 = arith.truncf %15 : vector<8x128xf32> to vector<8x128xbf16>
    %c128 = arith.constant 128 : index
    %c0_15 = arith.constant 0 : index
    %19 = vector.load %arg4[%c128, %c0_15] : memref<256x384xbf16, #tpu.memory_space<vmem>>, vector<128x384xbf16>
    %cst_16 = arith.constant dense<0.000000e+00> : vector<8x384xf32>
    %20 = tpu.matmul %18, %19, %cst_16 {dimension_numbers = #tpu.dot_dimension_numbers<[1], [0], [0], [1], [0, 0, 1, 1], [], []>} : vector<8x128xbf16>, vector<128x384xbf16>, vector<8x384xf32> -> vector<8x384xf32>
    %21 = arith.addf %17, %20 : vector<8x384xf32>
    %c0_17 = arith.constant 0 : index
    %c0_18 = arith.constant 0 : index
    %22 = vector.load %arg5[%c0_17, %c0_18] : memref<1x384xf32, #tpu.memory_space<vmem>>, vector<1x384xf32>
    %23 = vector.broadcast %22 : vector<1x384xf32> to vector<8x384xf32>
    %24 = arith.addf %21, %23 : vector<8x384xf32>
    %cst_19 = arith.constant 0.000000e+00 : f32
    %25 = vector.broadcast %cst_19 : f32 to vector<8x384xf32>
    %26 = arith.maximumf %24, %25 : vector<8x384xf32>
    %27 = arith.extf %14 : vector<8x128xbf16> to vector<8x128xf32>
    %28 = tpu.concatenate %27, %27, %27 in 1 : vector<8x128xf32>, vector<8x128xf32>, vector<8x128xf32> -> vector<8x384xf32>
    %29 = arith.addf %26, %28 : vector<8x384xf32>
    %30 = tpu.iota {dimensions = array<i32: 0>} : vector<8x1xi32>
    %c8_i32 = arith.constant 8 : i32
    %31 = vector.broadcast %c8_i32 : i32 to vector<8x1xi32>
    %32 = arith.cmpi slt, %30, %31 : vector<8x1xi32>
    %33 = arith.extui %32 : vector<8x1xi1> to vector<8x1xi32>
    %34 = arith.sitofp %33 : vector<8x1xi32> to vector<8x1xf32>
    %35 = vector.broadcast %34 : vector<8x1xf32> to vector<8x384xf32>
    %36 = arith.mulf %29, %35 : vector<8x384xf32>
    %cst_20 = arith.constant dense<0.000000e+00> : vector<384xf32>
    %37 = vector.multi_reduction <add>, %36, %cst_20 [0] : vector<8x384xf32> to vector<384xf32>
    %38 = vector.shape_cast %37 : vector<384xf32> to vector<1x384xf32>
    %cst_21 = arith.constant 1.250000e-01 : f32
    %39 = vector.broadcast %cst_21 : f32 to vector<1x384xf32>
    %40 = arith.mulf %38, %39 : vector<1x384xf32>
    %41 = arith.mulf %36, %29 : vector<8x384xf32>
    %cst_22 = arith.constant dense<0.000000e+00> : vector<384xf32>
    %42 = vector.multi_reduction <add>, %41, %cst_22 [0] : vector<8x384xf32> to vector<384xf32>
    %43 = vector.shape_cast %42 : vector<384xf32> to vector<1x384xf32>
    %cst_23 = arith.constant 1.250000e-01 : f32
    %44 = vector.broadcast %cst_23 : f32 to vector<1x384xf32>
    %45 = arith.mulf %43, %44 : vector<1x384xf32>
    %46 = arith.mulf %40, %40 : vector<1x384xf32>
    %47 = arith.subf %45, %46 : vector<1x384xf32>
    %cst_24 = arith.constant 0.000000e+00 : f32
    %48 = vector.broadcast %cst_24 : f32 to vector<1x384xf32>
    %49 = arith.maximumf %47, %48 : vector<1x384xf32>
    %cst_25 = arith.constant 9.99999974E-6 : f32
    %50 = vector.broadcast %cst_25 : f32 to vector<1x384xf32>
    %51 = arith.addf %49, %50 : vector<1x384xf32>
    %52 = math.rsqrt %51 : vector<1x384xf32>
    %53 = arith.truncf %29 : vector<8x384xf32> to vector<8x384xbf16>
    %54 = arith.extf %53 : vector<8x384xbf16> to vector<8x384xf32>
    %55 = vector.broadcast %40 : vector<1x384xf32> to vector<8x384xf32>
    %56 = arith.subf %54, %55 : vector<8x384xf32>
    %57 = vector.broadcast %52 : vector<1x384xf32> to vector<8x384xf32>
    %58 = arith.mulf %56, %57 : vector<8x384xf32>
    %c0_26 = arith.constant 0 : index
    %c0_27 = arith.constant 0 : index
    %59 = vector.load %arg6[%c0_26, %c0_27] : memref<384x256xf32, #tpu.memory_space<vmem>>, vector<384x256xf32>
    %cst_28 = arith.constant dense<0.000000e+00> : vector<8x256xf32>
    %60 = tpu.matmul %58, %59, %cst_28 {dimension_numbers = #tpu.dot_dimension_numbers<[1], [0], [0], [1], [0, 0, 1, 1], [], []>} : vector<8x384xf32>, vector<384x256xf32>, vector<8x256xf32> -> vector<8x256xf32>
    %c0_29 = arith.constant 0 : index
    %c0_30 = arith.constant 0 : index
    %61 = vector.load %arg7[%c0_29, %c0_30] : memref<1x256xf32, #tpu.memory_space<vmem>>, vector<1x256xf32>
    %62 = vector.broadcast %61 : vector<1x256xf32> to vector<8x256xf32>
    %63 = arith.addf %60, %62 : vector<8x256xf32>
    %cst_31 = arith.constant 0.000000e+00 : f32
    %64 = vector.broadcast %cst_31 : f32 to vector<8x256xf32>
    %65 = arith.cmpf ogt, %63, %64 : vector<8x256xf32>
    %cst_32 = arith.constant 0.00999999977 : f32
    %66 = vector.broadcast %cst_32 : f32 to vector<8x256xf32>
    %67 = arith.mulf %66, %63 : vector<8x256xf32>
    %68 = arith.select %65, %63, %67 : vector<8x256xi1>, vector<8x256xf32>
    %c0_33 = arith.constant 0 : index
    %c0_34 = arith.constant 0 : index
    %69 = vector.load %arg8[%c0_33, %c0_34] : memref<8x256xf32, #tpu.memory_space<vmem>>, vector<8x256xf32>
    tpu.vector_store %arg8[%c0_33, %c0_34], %68 {strides = array<i32>} : memref<8x256xf32, #tpu.memory_space<vmem>>, vector<8x256xf32>,
    return
  }
}

</mosaic_0001>

<bundles_post_ra>
// kernel: task_graph_encoder.1
= control target key start
LH: loop header
LB: loop body
LE: loop exit
PB: predicated region body
PF: predicated region fallthrough
CT: control target
= control target key end

     0   :  { %vm37_vm0 = vcmask 1043456   ;;  %vm33_vm1 = vcmask 64512   ;;  %v1470_v1 = vmov 0.0   ;;  %vm1471_vm2 = vmmov 0   ;;  %s2071_s0 = inlined_call_operand.vmem [shape: bf16[8,32], index: 0, kind: input, shape index: {}]   ;;  %s2072_s1 = inlined_call_operand.vmem [shape: bf16[8,8], index: 1, kind: input, shape index: {}]   ;;  %s2073_s2 = inlined_call_operand.vmem [shape: bf16[64,128], index: 2, kind: input, shape index: {}]   ;;  %s2074_s3 = inlined_call_operand.vmem [shape: f32[1,128], index: 3, kind: input, shape index: {}]   ;;  %s2075_s4 = inlined_call_operand.vmem [shape: bf16[256,384], index: 4, kind: input, shape index: {}]   ;;  %s2076_s5 = inlined_call_operand.vmem [shape: f32[1,384], index: 5, kind: input, shape index: {}]   ;;  %s2077_s6 = inlined_call_operand.vmem [shape: f32[384,256], index: 6, kind: input, shape index: {}]   ;;  %s2078_s7 = inlined_call_operand.vmem [shape: f32[1,256], index: 7, kind: input, shape index: {}]   ;;  %s2079_s8 = inlined_call_operand.hbm [shape: f32[8,256], index: 8, kind: output, shape index: {}]  }
   0x1   :  { %v31_v0 = vld [vmem:[%s2071_s0] sm:$0xf]  ;;  %1200 = vmatprep.subr.bf16.mxu1 %v1470_v1  ;;  %1202 = vmatprep.mubr.msk.bf16.mxu1 %vm1471_vm2, %v1470_v1  ;;  %v1372_v4 = vld [vmem:[%s2073_s2 + $0x10] sm:$0xff]  }
   0x2   :  { %v39_v2 = vsel %vm37_vm0, %v31_v0, 0  ;;  %v1529_v3 = vld [vmem:[%s2072_s1] sm:$0xf] }
   0x3   :  { %1201 = vmatpush3.bf16.msra.mxu1 %v39_v2 }
   0x4   :  { %1206 = vmatprep.subr.bf16.mxu1 %v1470_v1 }
   0x6   :  { %1203 = vmatmul.mubr.msk.bf16.vlgmr.msra.gmra.mrb[0].mxu1 %vm33_vm1, %v1529_v3 }
   0x7   :  { %1207 = vmatpush3.bf16.msra.mxu1 %v1372_v4  ;;  %1210 = vmatprep.mubr.msk.bf16.mxu1 %vm1471_vm2, %v1470_v1 }
   0x8   :  { %1208 = vmatprep.subr.bf16.mxu1 %v1470_v1 }
   0x9   :  { %13 = vsyncpa [#allocation3], 0  ;;  %v1373_v5 = vld [vmem:[%s2073_s2 + $0x18] sm:$0xff]   ;;  %v1376_v6 = vld [vmem:[%s2075_s4 + $0x4] ss:$12 sps:$4 sm:$0xff]   ;;  %vm102_vm3 = vcmask 261120  }
   0xa   :  { %v1378_v7 = vld [vmem:[%s2075_s4] ss:$12 sps:$4 sm:$0xff]   ;;  %v1379_v8 = vld [vmem:[%s2075_s4 + $0x1c] ss:$12 sps:$4 sm:$0xff]   ;;  %655 = vmatprep.subr.bf16.mxu0 %v1376_v6  ;;  %v1381_v9 = vld [vmem:[%s2075_s4 + $0x18] ss:$12 sps:$4 sm:$0xff]  }
   0xb   :  { %1209 = vmatpush3.bf16.msra.mxu1 %v1373_v5  ;;  %656 = vmatpush1.bf16.msra.mxu0 %v1378_v7  ;;  %v1382_v10 = vld [vmem:[%s2075_s4 + $0x34] ss:$12 sps:$4 sm:$0xff]   ;;  %v1384_v11 = vld [vmem:[%s2075_s4 + $0x30] ss:$12 sps:$4 sm:$0xff]   ;;  %v1385_v12 = vld [vmem:[%s2075_s4 + $0x4c] ss:$12 sps:$4 sm:$0xff]  }
   0xc   :  { %1214 = vmatprep.subr.bf16.mxu1 %v1470_v1  ;;  %657 = vmatprep.subr.bf16.mxu0 %v1379_v8  ;;  %v1387_v13 = vld [vmem:[%s2075_s4 + $0x48] ss:$12 sps:$4 sm:$0xff]   ;;  %v1374_v15 = vld [vmem:[%s2073_s2] sm:$0xff]   ;;  %v1396_v26 = vld [vmem:[%s2075_s4 + $0x90] ss:$12 sps:$4 sm:$0xff]   ;;  %v1472_v29 = vmov 0  }
   0xd   :  { %v1375_v20 = vld [vmem:[%s2073_s2 + $0x8] sm:$0xff]   ;;  %v1388_v21 = vld [vmem:[%s2075_s4 + $0x64] ss:$12 sps:$4 sm:$0xff]   ;;  %v1394_v25 = vld [vmem:[%s2075_s4 + $0x94] ss:$12 sps:$4 sm:$0xff]   ;;  %687 = vmatprep.mubr.bf16.mxu0 %v1472_v29  ;;  %s1473_s14 = smov [#allocation2]  }
   0xe   :  { %v1390_v22 = vld [vmem:[%s2075_s4 + $0x60] ss:$12 sps:$4 sm:$0xff]   ;;  %v1391_v23 = vld [vmem:[%s2075_s4 + $0x7c] ss:$12 sps:$4 sm:$0xff]   ;;  %v1393_v24 = vld [vmem:[%s2075_s4 + $0x78] ss:$12 sps:$4 sm:$0xff]  }
   0xf   :  { %658 = vmatpush1.bf16.msra.mxu0 %v1381_v9  ;;  %v1397_v27 = vld [vmem:[%s2075_s4 + $0xac] ss:$12 sps:$4 sm:$0xff]   ;;  %v1399_v28 = vld [vmem:[%s2075_s4 + $0xa8] ss:$12 sps:$4 sm:$0xff]   ;;  %v1122_v35 = vld [vmem:[%s2074_s3] ss:$0 sm:$0xff] }
  0x10   :  { %659 = vmatprep.subr.bf16.mxu0 %v1382_v10  ;;  %v1402_v43 = vld [vmem:[%s2075_s4 + $0xc4] ss:$12 sps:$4 sm:$0xff]   ;;  %v1400_v45 = vld [vmem:[%s2075_s4 + $0xc0] ss:$12 sps:$4 sm:$0xff]   ;;  %v1405_v46 = vld [vmem:[%s2075_s4 + $0xdc] ss:$12 sps:$4 sm:$0xff]  }
  0x11   :  { %v1403_v47 = vld [vmem:[%s2075_s4 + $0xd8] ss:$12 sps:$4 sm:$0xff]   ;;  %v1408_v48 = vld [vmem:[%s2075_s4 + $0xf4] ss:$12 sps:$4 sm:$0xff]   ;;  %v1406_v49 = vld [vmem:[%s2075_s4 + $0xf0] ss:$12 sps:$4 sm:$0xff]  }
  0x12   :  { %v1411_v50 = vld [vmem:[%s2075_s4 + $0x10c] ss:$12 sps:$4 sm:$0xff]   ;;  %v1409_v51 = vld [vmem:[%s2075_s4 + $0x108] ss:$12 sps:$4 sm:$0xff]   ;;  %v1414_v52 = vld [vmem:[%s2075_s4 + $0x124] ss:$12 sps:$4 sm:$0xff]  }
  0x13   :  { %660 = vmatpush1.bf16.msra.mxu0 %v1384_v11  ;;  %v1412_v53 = vld [vmem:[%s2075_s4 + $0x120] ss:$12 sps:$4 sm:$0xff]   ;;  %v1417_v54 = vld [vmem:[%s2075_s4 + $0x13c] ss:$12 sps:$4 sm:$0xff]   ;;  %v1415_v55 = vld [vmem:[%s2075_s4 + $0x138] ss:$12 sps:$4 sm:$0xff]  }
  0x14   :  { %661 = vmatprep.subr.bf16.mxu0 %v1385_v12  ;;  %v1420_v56 = vld [vmem:[%s2075_s4 + $0x154] ss:$12 sps:$4 sm:$0xff]   ;;  %v1418_v57 = vld [vmem:[%s2075_s4 + $0x150] ss:$12 sps:$4 sm:$0xff]   ;;  %v1423_v58 = vld [vmem:[%s2075_s4 + $0x16c] ss:$12 sps:$4 sm:$0xff]  }
  0x15   :  { %v1421_v59 = vld [vmem:[%s2075_s4 + $0x168] ss:$12 sps:$4 sm:$0xff]   ;;  %v846_v61 = vld [vmem:[%s2077_s6 + $0x18] sm:$0xff]  ;;  %v843_v62 = vld [vmem:[%s2077_s6] sm:$0xff]  ;;  %s1107_s15 = sshll.u32 %s1473_s14, 4  ;;  %s1108_s15 = int_to_ptr.vmem [resolvable:$true] %s1107_s15 }
  0x16   :  { %v844_v60 = vld [vmem:[%s2077_s6 + $0x8] sm:$0xff]  ;;  %v847_v6 = vld [vmem:[%s2077_s6 + $0x20] sm:$0xff]  ;;  %v849_v7 = vld [vmem:[%s2077_s6 + $0x30] sm:$0xff]  ;;  %p1451_p1 = scmp.lt.s32.totalorder %s1108_s15, %s1108_s15 }
  0x17   :  { %662 = vmatpush1.bf16.msra.mxu0 %v1387_v13  ;;  %v1268_v63 = vpack.c.bf16 %v846_v61, %v844_v60  ;;  %v848_v2 = vld [vmem:[%s2077_s6 + $0x28] sm:$0xff]  ;;  %v854_v9 = vld [vmem:[%s2077_s6 + $0x58] sm:$0xff]  ;;  %v1274_v10 = vpack.c.bf16 %v849_v7, %v847_v6  ;;  %v851_v12 = vld [vmem:[%s2077_s6 + $0x40] sm:$0xff] }
  0x18   :  { %663 = vmatprep.subr.bf16.mxu0 %v1388_v21  ;;  %v852_v8 = vld [vmem:[%s2077_s6 + $0x48] sm:$0xff]  ;;  %v853_v13 = vld [vmem:[%s2077_s6 + $0x50] sm:$0xff]  ;;  %v862_v21 = vld [vmem:[%s2077_s6 + $0x98] sm:$0xff] }
  0x19   :  { %v1276_v11 = vpack.c.bf16 %v854_v9, %v852_v8  ;;  %v870_v60 = vld [vmem:[%s2077_s6 + $0xd8] sm:$0xff]  ;;  %v873_v6 = vld [vmem:[%s2077_s6 + $0xf0] sm:$0xff]  ;;  %v876_v8 = vld [vmem:[%s2077_s6 + $0x108] sm:$0xff] }
  0x1a   :  { %v878_v9 = vld [vmem:[%s2077_s6 + $0x118] sm:$0xff] }
  0x1b   :  { %664 = vmatpush1.bf16.msra.mxu0 %v1390_v22 }
  0x1c   :  { %665 = vmatprep.subr.bf16.mxu0 %v1391_v23 }
  0x1f   :  { %666 = vmatpush1.bf16.msra.mxu0 %v1393_v24  ;;  %v859_v24 = vld [vmem:[%s2077_s6 + $0x80] sm:$0xff] }
  0x20   :  { %667 = vmatprep.subr.bf16.mxu0 %v1394_v25  ;;  %v861_v25 = vld [vmem:[%s2077_s6 + $0x90] sm:$0xff] }
  0x23   :  { %668 = vmatpush1.bf16.msra.mxu0 %v1396_v26  ;;  %v1286_v26 = vpack.c.bf16 %v861_v25, %v859_v24  ;;  %v885_v24 = vld [vmem:[%s2077_s6 + $0x150] sm:$0xff]  ;;  %v888_v25 = vld [vmem:[%s2077_s6 + $0x168] sm:$0xff] }
  0x24   :  { %669 = vmatprep.subr.bf16.mxu0 %v1397_v27 }
  0x27   :  { %670 = vmatpush1.bf16.msra.mxu0 %v1399_v28 }
  0x28   :  { %1269 = vmatprep.subr.bf16.mxu0 %v1268_v63  ;;  %v869_v63 = vld [vmem:[%s2077_s6 + $0xd0] sm:$0xff] }
  0xd9   :  { %v75_v14 = vpop.f32.mrb[0].mxu1 }
  0xda   :  { %v85_v16 = vpack.c.bf16 %v75_v14, %v75_v14  ;;  %v1204_v17 = vpop.f32.mrb[1].mxu1  ;;  %v856_v14 = vld [vmem:[%s2077_s6 + $0x68] sm:$0xff] }
  0xdb   :  { %v78_v18 = vpop.f32.mrb[2].mxu1 }
  0xdc   :  { %v1205_v19 = vpop.f32.mrb[3].mxu1  ;;  %1211 = vmatmul.mubr.msk.bf16.vlgmr.msra.gmra.mrb[4].mxu1 %vm102_vm3, %v85_v16  ;;  %v1278_v16 = vpack.c.bf16 %v853_v13, %v851_v12  ;;  %v855_v18 = vld [vmem:[%s2077_s6 + $0x60] sm:$0xff]  ;;  %v877_v12 = vld [vmem:[%s2077_s6 + $0x110] sm:$0xff] }
  0xdd   :  { %1215 = vmatpush3.bf16.msra.mxu1 %v1374_v15  ;;  %1218 = vmatprep.mubr.msk.bf16.mxu1 %vm1471_vm2, %v1470_v1  ;;  %v858_v15 = vld [vmem:[%s2077_s6 + $0x78] sm:$0xff]  ;;  %v857_v19 = vld [vmem:[%s2077_s6 + $0x70] sm:$0xff] }
  0xde   :  { %1216 = vmatprep.subr.bf16.mxu1 %v1470_v1  ;;  %v1280_v17 = vpack.c.bf16 %v858_v15, %v856_v14  ;;  %v1282_v22 = vpack.c.bf16 %v857_v19, %v855_v18  ;;  %v880_v14 = vld [vmem:[%s2077_s6 + $0x128] sm:$0xff]  ;;  %v882_v15 = vld [vmem:[%s2077_s6 + $0x138] sm:$0xff]  ;;  %v881_v18 = vld [vmem:[%s2077_s6 + $0x130] sm:$0xff] }
  0xe1   :  { %1217 = vmatpush3.bf16.msra.mxu1 %v1375_v20  ;;  %v860_v20 = vld [vmem:[%s2077_s6 + $0x88] sm:$0xff] }
  0xe2   :  { %1222 = vmatprep.subr.bf16.mxu1 %v1470_v1  ;;  %v1284_v23 = vpack.c.bf16 %v862_v21, %v860_v20  ;;  %v884_v20 = vld [vmem:[%s2077_s6 + $0x148] sm:$0xff]  ;;  %v886_v21 = vld [vmem:[%s2077_s6 + $0x158] sm:$0xff] }
  0xe4   :  { %1219 = vmatmul.mubr.msk.bf16.vlgmr.msra.gmra.mrb[8].mxu1 %vm102_vm3, %v31_v0  ;;  %v845_v0 = vld [vmem:[%s2077_s6 + $0x10] sm:$0xff] }
  0xe5   :  { %1224 = vmatprep.mubr.msk.bf16.mxu1 %vm1471_vm2, %v1470_v1  ;;  %v1270_v4 = vpack.c.bf16 %v845_v0, %v843_v62  ;;  %v867_v62 = vld [vmem:[%s2077_s6 + $0xc0] sm:$0xff] }
  0xe6   :  { %v1294_v0 = vpack.c.bf16 %v869_v63, %v867_v62  ;;  %v738_v62 = vlaneseq }
  0xe8   :  { %v1933_v63 = vshrl.u32 %v738_v62, 7 }
 0x1af   :  { %v140_v30 = vpop.f32.mrb[4].mxu1 }
 0x1b0   :  { %v1212_v31 = vpop.f32.mrb[5].mxu1 }
 0x1b1   :  { %v143_v32 = vpop.f32.mrb[6].mxu1 }
 0x1b2   :  { %v1213_v33 = vpop.f32.mrb[7].mxu1  ;;  %v1424_v32 = vld [vmem:[%s2075_s4 + $0xc8] ss:$12 sps:$4 sm:$0xff]  }
 0x1b7   :  { %v194_v34 = vpop.f32.mrb[8].mxu1 }
 0x1b8   :  { %v195_v36 = vadd.f32 %v194_v34, %v140_v30  ;;  %v1220_v37 = vpop.f32.mrb[9].mxu1 }
 0x1b9   :  { %v197_v38 = vpop.f32.mrb[10].mxu1  ;;  %v1425_v37 = vld [vmem:[%s2075_s4 + $0xe0] ss:$12 sps:$4 sm:$0xff]  }
 0x1ba   :  { %v207_v39 = vadd.f32 %v1122_v35, %v195_v36  ;;  %v1221_v40 = vpop.f32.mrb[11].mxu1  ;;  %v1426_v38 = vld [vmem:[%s2075_s4 + $0xf8] ss:$12 sps:$4 sm:$0xff]  }
 0x1bb   :  { %v1428_v40 = vld [vmem:[%s2075_s4 + $0x128] ss:$12 sps:$4 sm:$0xff]  }
 0x1bc   :  { %v208_v41 = vmax.f32 %v207_v39, 0.0  ;;  %v1427_v39 = vld [vmem:[%s2075_s4 + $0x110] ss:$12 sps:$4 sm:$0xff]  }
 0x1be   :  { %v1607_v42 = vpack.c.bf16 %v208_v41, %v208_v41  ;;  %v1429_v41 = vld [vmem:[%s2075_s4 + $0x140] ss:$12 sps:$4 sm:$0xff]  }
 0x1c0   :  { %688 = vmatmul.mubr.bf16.vlgmr.msra.gmra.mrb[0].mxu0 %v1607_v42  ;;  %v211_v44 = vsel %vm37_vm0, %v1607_v42, 0 }
 0x1c1   :  { %1223 = vmatpush3.bf16.msra.mxu1 %v211_v44  ;;  %1271 = vmatpush1.bf16.msra.mxu0 %v1270_v4  ;;  %v1431_v44 = vld [vmem:[%s2075_s4 + $0x170] ss:$12 sps:$4 sm:$0xff]  }
 0x1c2   :  { %446 = vmatprep.subr.bf16.mxu1 %v1402_v43  ;;  %v1430_v43 = vld [vmem:[%s2075_s4 + $0x158] ss:$12 sps:$4 sm:$0xff]  }
 0x1c4   :  { %1225 = vmatmul.mubr.msk.bf16.vlgmr.msra.gmra.mrb[12].mxu1 %vm33_vm1, %v1529_v3  ;;  %v850_v3 = vld [vmem:[%s2077_s6 + $0x38] sm:$0xff] }
 0x1c5   :  { %447 = vmatpush1.bf16.msra.mxu1 %v1400_v45  ;;  %478 = vmatprep.mubr.bf16.mxu1 %v1472_v29  ;;  %v1272_v5 = vpack.c.bf16 %v850_v3, %v848_v2  ;;  %v1432_v45 = vld [vmem:[%s2075_s4 + $0x8] ss:$12 sps:$4 sm:$0xff]   ;;  %v874_v3 = vld [vmem:[%s2077_s6 + $0xf8] sm:$0xff] }
 0x1c6   :  { %448 = vmatprep.subr.bf16.mxu1 %v1405_v46  ;;  %v1433_v46 = vld [vmem:[%s2075_s4 + $0x20] ss:$12 sps:$4 sm:$0xff]  }
 0x1c7   :  { %1273 = vmatprep.subr.bf16.mxu0 %v1272_v5  ;;  %v872_v2 = vld [vmem:[%s2077_s6 + $0xe8] sm:$0xff]  ;;  %v871_v5 = vld [vmem:[%s2077_s6 + $0xe0] sm:$0xff] }
 0x1c8   :  { %1275 = vmatpush1.bf16.msra.mxu0 %v1274_v10  ;;  %v1296_v4 = vpack.c.bf16 %v874_v3, %v872_v2  ;;  %v1298_v7 = vpack.c.bf16 %v873_v6, %v871_v5  ;;  %v1300_v10 = vpack.c.bf16 %v878_v9, %v876_v8  ;;  %v1939_v2 = vld [vmem:[%s2076_s5] sm:$0x7]  ;;  %v744_v3 = vsub.s32 1, %v1933_v63 }
 0x1c9   :  { %449 = vmatpush1.bf16.msra.mxu1 %v1403_v47  ;;  %1277 = vmatprep.subr.bf16.mxu0 %v1276_v11  ;;  %v1434_v47 = vld [vmem:[%s2075_s4 + $0x38] ss:$12 sps:$4 sm:$0xff]  }
 0x1ca   :  { %450 = vmatprep.subr.bf16.mxu1 %v1408_v48  ;;  %v1435_v48 = vld [vmem:[%s2075_s4 + $0x50] ss:$12 sps:$4 sm:$0xff]   ;;  %v875_v11 = vld [vmem:[%s2077_s6 + $0x100] sm:$0xff]  ;;  %v745_v6 = vrot.slane %v1939_v2, %v744_v3 }
 0x1cb   :  { %v1302_v13 = vpack.c.bf16 %v877_v12, %v875_v11 }
 0x1cc   :  { %1279 = vmatpush1.bf16.msra.mxu0 %v1278_v16  ;;  %v1304_v16 = vpack.c.bf16 %v882_v15, %v880_v14  ;;  %v1951_v15 = vunpack.c.l.bf16 %v1607_v42 }
 0x1cd   :  { %451 = vmatpush1.bf16.msra.mxu1 %v1406_v49  ;;  %1281 = vmatprep.subr.bf16.mxu0 %v1280_v17  ;;  %v1436_v49 = vld [vmem:[%s2075_s4 + $0x68] ss:$12 sps:$4 sm:$0xff]   ;;  %v879_v17 = vld [vmem:[%s2077_s6 + $0x120] sm:$0xff] }
 0x1ce   :  { %452 = vmatprep.subr.bf16.mxu1 %v1411_v50  ;;  %v1437_v50 = vld [vmem:[%s2075_s4 + $0x80] ss:$12 sps:$4 sm:$0xff]   ;;  %v1306_v19 = vpack.c.bf16 %v881_v18, %v879_v17 }
 0x1d0   :  { %1283 = vmatpush1.bf16.msra.mxu0 %v1282_v22  ;;  %v883_v22 = vld [vmem:[%s2077_s6 + $0x140] sm:$0xff] }
 0x1d1   :  { %453 = vmatpush1.bf16.msra.mxu1 %v1409_v51  ;;  %1285 = vmatprep.subr.bf16.mxu0 %v1284_v23  ;;  %v1438_v51 = vld [vmem:[%s2075_s4 + $0x98] ss:$12 sps:$4 sm:$0xff]   ;;  %v1308_v23 = vpack.c.bf16 %v886_v21, %v884_v20 }
 0x1d2   :  { %454 = vmatprep.subr.bf16.mxu1 %v1414_v52  ;;  %v1439_v52 = vld [vmem:[%s2075_s4 + $0xb0] ss:$12 sps:$4 sm:$0xff]  }
 0x1d4   :  { %1287 = vmatpush1.bf16.msra.mxu0 %v1286_v26  ;;  %v890_v26 = vld [vmem:[%s2077_s6 + $0x178] sm:$0xff] }
 0x1d5   :  { %455 = vmatpush1.bf16.msra.mxu1 %v1412_v53  ;;  %v864_v53 = vld [vmem:[%s2077_s6 + $0xa8] sm:$0xff] }
 0x1d6   :  { %456 = vmatprep.subr.bf16.mxu1 %v1417_v54  ;;  %v866_v54 = vld [vmem:[%s2077_s6 + $0xb8] sm:$0xff] }
 0x1d9   :  { %457 = vmatpush1.bf16.msra.mxu1 %v1415_v55  ;;  %v1288_v55 = vpack.c.bf16 %v866_v54, %v864_v53  ;;  %v906_v53 = vld [vmem:[%s2077_s6 + $0x1f8] sm:$0xff] }
 0x1da   :  { %458 = vmatprep.subr.bf16.mxu1 %v1420_v56  ;;  %v863_v56 = vld [vmem:[%s2077_s6 + $0xa0] sm:$0xff] }
 0x1db   :  { %1289 = vmatprep.subr.bf16.mxu0 %v1288_v55 }
 0x1dd   :  { %459 = vmatpush1.bf16.msra.mxu1 %v1418_v57  ;;  %v865_v57 = vld [vmem:[%s2077_s6 + $0xb0] sm:$0xff] }
 0x1de   :  { %460 = vmatprep.subr.bf16.mxu1 %v1423_v58  ;;  %v1290_v58 = vpack.c.bf16 %v865_v57, %v863_v56  ;;  %v903_v56 = vld [vmem:[%s2077_s6 + $0x1e0] sm:$0xff]  ;;  %v905_v57 = vld [vmem:[%s2077_s6 + $0x1f0] sm:$0xff] }
 0x1e0   :  { %1291 = vmatpush1.bf16.msra.mxu0 %v1290_v58  ;;  %v1330_v58 = vpack.c.bf16 %v905_v57, %v903_v56 }
 0x1e1   :  { %461 = vmatpush1.bf16.msra.mxu1 %v1421_v59  ;;  %v868_v59 = vld [vmem:[%s2077_s6 + $0xc8] sm:$0xff] }
 0x1e2   :  { %1228 = vmatprep.subr.bf16.mxu1 %v1470_v1  ;;  %v1292_v61 = vpack.c.bf16 %v870_v60, %v868_v59  ;;  %v908_v59 = vld [vmem:[%s2077_s6 + $0x208] sm:$0xff]  ;;  %v910_v60 = vld [vmem:[%s2077_s6 + $0x218] sm:$0xff] }
 0x1e4   :  { %1293 = vmatprep.subr.bf16.mxu0 %v1292_v61  ;;  %v1332_v61 = vpack.c.bf16 %v910_v60, %v908_v59 }
 0x1e5   :  { %1295 = vmatpush1.bf16.msra.mxu0 %v1294_v0  ;;  %v740_v0 = vsub.s32 0, %v1933_v63 }
 0x1e6   :  { %1297 = vmatprep.subr.bf16.mxu0 %v1296_v4 }
 0x1e7   :  { %v741_v4 = vrot.slane %v1939_v2, %v740_v0 }
 0x1e9   :  { %1299 = vmatpush1.bf16.msra.mxu0 %v1298_v7 }
 0x1ea   :  { %1301 = vmatprep.subr.bf16.mxu0 %v1300_v10 }
 0x1ed   :  { %1303 = vmatpush1.bf16.msra.mxu0 %v1302_v13 }
 0x1ee   :  { %1305 = vmatprep.subr.bf16.mxu0 %v1304_v16 }
 0x1f1   :  { %1307 = vmatpush1.bf16.msra.mxu0 %v1306_v19 }
 0x1f2   :  { %1309 = vmatprep.subr.bf16.mxu0 %v1308_v23 }
 0x293   :  { %v1723_v27 = vpop.f32.mrb[0].mxu0 }
 0x294   :  { %v1725_v28 = vpop.f32.mrb[1].mxu0 }
 0x295   :  { %v693_v29 = vpop.f32.mrb[2].mxu0 }
 0x296   :  { %v694_v30 = vpop.f32.mrb[3].mxu0  ;;  %v1310_v29 = vpack.c.bf16 %v885_v24, %v883_v22 }
 0x297   :  { %v247_v31 = vpop.f32.mrb[12].mxu1  ;;  %v1312_v30 = vpack.c.bf16 %v890_v26, %v888_v25 }
 0x298   :  { %v285_v33 = vpack.c.bf16 %v247_v31, %v247_v31  ;;  %v1226_v34 = vpop.f32.mrb[13].mxu1  ;;  %v887_v31 = vld [vmem:[%s2077_s6 + $0x160] sm:$0xff]  ;;  %1311 = vmatpush1.bf16.msra.mxu0 %v1310_v29 }
 0x299   :  { %v250_v35 = vpop.f32.mrb[14].mxu1  ;;  %v894_v34 = vld [vmem:[%s2077_s6 + $0x198] sm:$0xff]  ;;  %1313 = vmatprep.subr.bf16.mxu0 %v1312_v30 }
 0x29a   :  { %479 = vmatmul.mubr.bf16.vlgmr.msra.gmra.mrb[16].mxu1 %v285_v33  ;;  %v1227_v36 = vpop.f32.mrb[15].mxu1 }
 0x29b   :  { %1229 = vmatpush3.bf16.msra.mxu1 %v1424_v32  ;;  %1244 = vmatprep.mubr.msk.bf16.mxu1 %vm1471_vm2, %v1470_v1  ;;  %v889_v32 = vld [vmem:[%s2077_s6 + $0x170] sm:$0xff] }
 0x29c   :  { %1230 = vmatprep.subr.bf16.mxu1 %v1470_v1  ;;  %v1314_v35 = vpack.c.bf16 %v889_v32, %v887_v31 }
 0x29e   :  { %1315 = vmatpush1.bf16.msra.mxu0 %v1314_v35 }
 0x29f   :  { %1231 = vmatpush3.bf16.msra.mxu1 %v1425_v37  ;;  %v891_v37 = vld [vmem:[%s2077_s6 + $0x180] sm:$0xff] }
 0x2a0   :  { %1232 = vmatprep.subr.bf16.mxu1 %v1470_v1 }
 0x2a3   :  { %1233 = vmatpush3.bf16.msra.mxu1 %v1426_v38  ;;  %v893_v38 = vld [vmem:[%s2077_s6 + $0x190] sm:$0xff] }
 0x2a4   :  { %1234 = vmatprep.subr.bf16.mxu1 %v1470_v1 }
 0x2a7   :  { %1235 = vmatpush3.bf16.msra.mxu1 %v1427_v39  ;;  %v1318_v39 = vpack.c.bf16 %v893_v38, %v891_v37 }
 0x2a8   :  { %1236 = vmatprep.subr.bf16.mxu1 %v1470_v1 }
 0x2ab   :  { %1237 = vmatpush3.bf16.msra.mxu1 %v1428_v40  ;;  %v896_v40 = vld [vmem:[%s2077_s6 + $0x1a8] sm:$0xff] }
 0x2ac   :  { %1238 = vmatprep.subr.bf16.mxu1 %v1470_v1 }
 0x2af   :  { %1239 = vmatpush3.bf16.msra.mxu1 %v1429_v41  ;;  %v898_v41 = vld [vmem:[%s2077_s6 + $0x1b8] sm:$0xff] }
 0x2b0   :  { %1240 = vmatprep.subr.bf16.mxu1 %v1470_v1 }
 0x2b3   :  { %1241 = vmatpush3.bf16.msra.mxu1 %v1430_v43  ;;  %v1320_v43 = vpack.c.bf16 %v898_v41, %v896_v40 }
 0x2b4   :  { %1242 = vmatprep.subr.bf16.mxu1 %v1470_v1 }
 0x2b7   :  { %1243 = vmatpush3.bf16.msra.mxu1 %v1431_v44  ;;  %v895_v44 = vld [vmem:[%s2077_s6 + $0x1a0] sm:$0xff] }
 0x2b8   :  { %1248 = vmatprep.subr.bf16.mxu1 %v1470_v1 }
 0x2ba   :  { %1245 = vmatmul.mubr.bf16.vlgmr.msra.gmra.mrb[20].mxu1 %v285_v33  ;;  %v892_v33 = vld [vmem:[%s2077_s6 + $0x188] sm:$0xff] }
 0x2bb   :  { %1249 = vmatpush3.bf16.msra.mxu1 %v1432_v45  ;;  %1264 = vmatprep.mubr.msk.bf16.mxu1 %vm1471_vm2, %v1470_v1  ;;  %v1316_v36 = vpack.c.bf16 %v894_v34, %v892_v33  ;;  %v897_v45 = vld [vmem:[%s2077_s6 + $0x1b0] sm:$0xff] }
 0x2bc   :  { %1250 = vmatprep.subr.bf16.mxu1 %v1470_v1 }
 0x2bd   :  { %1317 = vmatprep.subr.bf16.mxu0 %v1316_v36 }
 0x2be   :  { %1319 = vmatpush1.bf16.msra.mxu0 %v1318_v39 }
 0x2bf   :  { %1251 = vmatpush3.bf16.msra.mxu1 %v1433_v46  ;;  %v1322_v46 = vpack.c.bf16 %v897_v45, %v895_v44  ;;  %1321 = vmatprep.subr.bf16.mxu0 %v1320_v43 }
 0x2c0   :  { %1252 = vmatprep.subr.bf16.mxu1 %v1470_v1 }
 0x2c2   :  { %1323 = vmatpush1.bf16.msra.mxu0 %v1322_v46 }
 0x2c3   :  { %1253 = vmatpush3.bf16.msra.mxu1 %v1434_v47  ;;  %v900_v47 = vld [vmem:[%s2077_s6 + $0x1c8] sm:$0xff] }
 0x2c4   :  { %1254 = vmatprep.subr.bf16.mxu1 %v1470_v1 }
 0x2c7   :  { %1255 = vmatpush3.bf16.msra.mxu1 %v1435_v48  ;;  %v902_v48 = vld [vmem:[%s2077_s6 + $0x1d8] sm:$0xff] }
 0x2c8   :  { %1256 = vmatprep.subr.bf16.mxu1 %v1470_v1 }
 0x2cb   :  { %1257 = vmatpush3.bf16.msra.mxu1 %v1436_v49  ;;  %v899_v49 = vld [vmem:[%s2077_s6 + $0x1c0] sm:$0xff] }
 0x2cc   :  { %1258 = vmatprep.subr.bf16.mxu1 %v1470_v1 }
 0x2cf   :  { %1259 = vmatpush3.bf16.msra.mxu1 %v1437_v50  ;;  %v1324_v50 = vpack.c.bf16 %v902_v48, %v900_v47 }
 0x2d0   :  { %1260 = vmatprep.subr.bf16.mxu1 %v1470_v1 }
 0x2d1   :  { %1325 = vmatprep.subr.bf16.mxu0 %v1324_v50 }
 0x2d3   :  { %1261 = vmatpush3.bf16.msra.mxu1 %v1438_v51  ;;  %v901_v51 = vld [vmem:[%s2077_s6 + $0x1d0] sm:$0xff] }
 0x2d4   :  { %1262 = vmatprep.subr.bf16.mxu1 %v1470_v1  ;;  %v1326_v54 = vpack.c.bf16 %v901_v51, %v899_v49 }
 0x2d6   :  { %1327 = vmatpush1.bf16.msra.mxu0 %v1326_v54 }
 0x2d7   :  { %1263 = vmatpush3.bf16.msra.mxu1 %v1439_v52  ;;  %v904_v52 = vld [vmem:[%s2077_s6 + $0x1e8] sm:$0xff] }
 0x2d8   :  { %v1328_v55 = vpack.c.bf16 %v906_v53, %v904_v52 }
 0x2da   :  { %1265 = vmatmul.mubr.bf16.vlgmr.msra.gmra.mrb[24].mxu1 %v1607_v42  ;;  %1329 = vmatprep.subr.bf16.mxu0 %v1328_v55 }
 0x2db   :  { %1331 = vmatpush1.bf16.msra.mxu0 %v1330_v58 }
 0x2dc   :  { %1333 = vmatprep.subr.bf16.mxu0 %v1332_v61 }
 0x36d   :  { %v480_v5 = vpop.f32.mrb[16].mxu1 }
 0x36e   :  { %v690_v7 = vadd.f32 %v1723_v27, %v480_v5  ;;  %v482_v8 = vpop.f32.mrb[17].mxu1 }
 0x36f   :  { %v692_v9 = vadd.f32 %v1725_v28, %v482_v8  ;;  %v484_v10 = vpop.f32.mrb[18].mxu1 }
 0x370   :  { %v753_v11 = vadd.f32 %v741_v4, %v690_v7  ;;  %v485_v12 = vpop.f32.mrb[19].mxu1  ;;  %v909_v7 = vld [vmem:[%s2077_s6 + $0x210] sm:$0xff]  ;;  %v912_v10 = vld [vmem:[%s2077_s6 + $0x228] sm:$0xff] }
 0x371   :  { %v754_v13 = vadd.f32 %v745_v6, %v692_v9  ;;  %v907_v6 = vld [vmem:[%s2077_s6 + $0x200] sm:$0xff] }
 0x372   :  { %v756_v14 = vmax.f32 %v753_v11, 0.0  ;;  %v914_v11 = vld [vmem:[%s2077_s6 + $0x238] sm:$0xff] }
 0x373   :  { %v757_v16 = vmax.f32 %v754_v13, 0.0 }
 0x374   :  { %v760_v17 = vadd.f32 %v1951_v15, %v756_v14 }
 0x375   :  { %v761_v18 = vadd.f32 %v1951_v15, %v757_v16  ;;  %v1334_v16 = vpack.c.bf16 %v909_v7, %v907_v6 }
 0x376   :  { %v771_v19 = vrot.slane %v760_v17, 4  ;;  %v792_v20 = vmul.f32 %v760_v17, %v760_v17  ;;  %v831_v62 = vpack.c.bf16 %v760_v17, %v760_v17 }
 0x377   :  { %v777_v21 = vrot.slane %v761_v18, 4  ;;  %v793_v27 = vmul.f32 %v761_v18, %v761_v18  ;;  %v832_v61 = vpack.c.bf16 %v761_v18, %v761_v18 }
 0x378   :  { %v772_v22 = vadd.f32 %v771_v19, %v760_v17  ;;  %v795_v23 = vrot.slane %v792_v20, 4  ;;  %v834_v5 = vunpack.c.l.bf16 %v831_v62  ;;  %v911_v19 = vld [vmem:[%s2077_s6 + $0x220] sm:$0xff]  ;;  %v937_v62 = vld [vmem:[%s2077_s6 + $0x2f0] sm:$0xff] }
 0x379   :  { %v801_v28 = vrot.slane %v793_v27, 4  ;;  %v778_v24 = vadd.f32 %v777_v21, %v761_v18  ;;  %v835_v4 = vunpack.c.l.bf16 %v832_v61  ;;  %v1336_v18 = vpack.c.bf16 %v914_v11, %v912_v10  ;;  %v916_v21 = vld [vmem:[%s2077_s6 + $0x248] sm:$0xff] }
 0x37a   :  { %v773_v25 = vrot.slane %v772_v22, 2  ;;  %v796_v26 = vadd.f32 %v795_v23, %v792_v20  ;;  %v913_v20 = vld [vmem:[%s2077_s6 + $0x230] sm:$0xff] }
 0x37b   :  { %v802_v29 = vadd.f32 %v801_v28, %v793_v27  ;;  %v779_v30 = vrot.slane %v778_v24, 2  ;;  %v918_v27 = vld [vmem:[%s2077_s6 + $0x258] sm:$0xff]  ;;  %v915_v28 = vld [vmem:[%s2077_s6 + $0x240] sm:$0xff] }
 0x37c   :  { %v797_v31 = vrot.slane %v796_v26, 2  ;;  %v774_v42 = vadd.f32 %v773_v25, %v772_v22  ;;  %v1338_v22 = vpack.c.bf16 %v913_v20, %v911_v19  ;;  %v1340_v23 = vpack.c.bf16 %v918_v27, %v916_v21  ;;  %v920_v25 = vld [vmem:[%s2077_s6 + $0x268] sm:$0xff] }
 0x37d   :  { %v803_v32 = vrot.slane %v802_v29, 2  ;;  %v780_v33 = vadd.f32 %v779_v30, %v778_v24  ;;  %v917_v24 = vld [vmem:[%s2077_s6 + $0x250] sm:$0xff]  ;;  %v919_v30 = vld [vmem:[%s2077_s6 + $0x260] sm:$0xff] }
 0x37e   :  { %v798_v34 = vadd.f32 %v797_v31, %v796_v26  ;;  %v775_v35 = vrot.slane %v774_v42, 1  ;;  %v922_v26 = vld [vmem:[%s2077_s6 + $0x278] sm:$0xff]  ;;  %v921_v31 = vld [vmem:[%s2077_s6 + $0x270] sm:$0xff] }
 0x37f   :  { %v781_v36 = vrot.slane %v780_v33, 1  ;;  %v804_v37 = vadd.f32 %v803_v32, %v802_v29  ;;  %v1344_v29 = vpack.c.bf16 %v922_v26, %v920_v25  ;;  %v926_v32 = vld [vmem:[%s2077_s6 + $0x298] sm:$0xff] }
 0x380   :  { %v799_v38 = vrot.slane %v798_v34, 1  ;;  %v776_v39 = vadd.f32 %v775_v35, %v774_v42  ;;  %v924_v42 = vld [vmem:[%s2077_s6 + $0x288] sm:$0xff]  ;;  %v923_v35 = vld [vmem:[%s2077_s6 + $0x280] sm:$0xff] }
 0x381   :  { %v782_v40 = vadd.f32 %v781_v36, %v780_v33  ;;  %v805_v41 = vrot.slane %v804_v37, 1  ;;  %v1346_v33 = vpack.c.bf16 %v921_v31, %v919_v30  ;;  %v925_v36 = vld [vmem:[%s2077_s6 + $0x290] sm:$0xff]  ;;  %v939_v30 = vld [vmem:[%s2078_s7] sm:$0x3]  ;;  %s1446_s7 = scalar_lea.vmem %s1108_s15, 256 }
 0x382   :  { %v789_v43 = vmul.f32 0.125, %v776_v39  ;;  %v800_v44 = vadd.f32 %v799_v38, %v798_v34  ;;  %v1348_v34 = vpack.c.bf16 %v926_v32, %v924_v42  ;;  %v930_v38 = vld [vmem:[%s2077_s6 + $0x2b8] sm:$0xff]  ;;  %v748_v39 = vsub.s32 2, %v1933_v63  ;;  %p1447_p0 = scmp.ne.s32.totalorder %s1108_s15, %s1446_s7  ;;  %p1452_p2 = scmp.lt.s32.totalorder %s1446_s7, %s1446_s7 }
 0x383   :  { %v790_v45 = vmul.f32 0.125, %v782_v40  ;;  %v806_v46 = vadd.f32 %v805_v41, %v804_v37  ;;  %v928_v37 = vld [vmem:[%s2077_s6 + $0x2a8] sm:$0xff]  ;;  %v1350_v40 = vpack.c.bf16 %v925_v36, %v923_v35  ;;  %v944_v31 = vrot.slane %v939_v30, %v740_v0 }
 0x384   :  { %v813_v47 = vmul.f32 0.125, %v800_v44  ;;  %v816_v48 = vmul.f32 %v789_v43, %v789_v43  ;;  %v837_v13 = vsub.f32 %v834_v5, %v789_v43  ;;  %v1352_v41 = vpack.c.bf16 %v930_v38, %v928_v37  ;;  %v927_v43 = vld [vmem:[%s2077_s6 + $0x2a0] sm:$0xff]  ;;  %v929_v44 = vld [vmem:[%s2077_s6 + $0x2b0] sm:$0xff]  ;;  %p1453_p3 = por %p1452_p2, %p1451_p1 }
 0x385   :  { %v814_v49 = vmul.f32 0.125, %v806_v46  ;;  %v817_v50 = vmul.f32 %v790_v45, %v790_v45  ;;  %v838_v9 = vsub.f32 %v835_v4, %v790_v45  ;;  %v932_v45 = vld [vmem:[%s2077_s6 + $0x2c8] sm:$0xff]  ;;  %v934_v46 = vld [vmem:[%s2077_s6 + $0x2d8] sm:$0xff]  ;;  %v948_v42 = vrot.slane %v939_v30, %v744_v3 }
 0x386   :  { %v819_v51 = vsub.f32 %v813_v47, %v816_v48  ;;  %v749_v47 = vrot.slane %v1939_v2, %v748_v39  ;;  %v1354_v48 = vpack.c.bf16 %v929_v44, %v927_v43  ;;  %v936_v2 = vld [vmem:[%s2077_s6 + $0x2e8] sm:$0xff]  ;;  %p1454_p4 = pnand %p1453_p3, %p1447_p0 }
 0x387   :  { %v820_v52 = vsub.f32 %v814_v49, %v817_v50  ;;  %v1356_v50 = vpack.c.bf16 %v934_v46, %v932_v45 }
 0x388   :  { %v822_v53 = vmax.f32 %v819_v51, 0.0  ;;  %v931_v51 = vld [vmem:[%s2077_s6 + $0x2c0] sm:$0xff] }
 0x389   :  { %v823_v54 = vmax.f32 %v820_v52, 0.0  ;;  %v933_v52 = vld [vmem:[%s2077_s6 + $0x2d0] sm:$0xff] }
 0x38a   :  { %v825_v55 = vadd.f32 1e-05, %v822_v53 }
 0x38b   :  { %v826_v56 = vadd.f32 1e-05, %v823_v54 }
 0x38c   :  { %1440 = vrsqrt.f32 %v825_v55  ;;  %v938_v55 = vld [vmem:[%s2077_s6 + $0x2f8] sm:$0xff] }
 0x38d   :  { %v1955_v57 = vpop.f32.mrb[20].mxu1  ;;  %1442 = vrsqrt.f32 %v826_v56  ;;  %v1360_v61 = vpack.c.bf16 %v938_v55, %v936_v2 }
 0x38e   :  { %v1246_v58 = vpop.f32.mrb[21].mxu1 }
 0x38f   :  { %v524_v59 = vpop.f32.mrb[22].mxu1 }
 0x390   :  { %v1247_v60 = vpop.f32.mrb[23].mxu1 }
 0x391   :  { %v1358_v60 = vpack.c.bf16 %v933_v52, %v931_v51 }
 0x396   :  { %v1441_v8 = vpop.eup %1440 }
 0x397   :  { %v1443_v12 = vpop.eup %1442  ;;  %v840_v17 = vmul.f32 %v1441_v8, %v837_v13 }
 0x398   :  { %v841_v14 = vmul.f32 %v1443_v12, %v838_v9 }
 0x39a   :  { %1015 = vmatprep.mubr.f32.mxu0 %v841_v14 }
 0x39b   :  { %1016 = vmatmul.mubr.f32.vlgmr.msra.gmra.mrb[4].mxu0 %v840_v17 }
 0x39c   :  { %1335 = vmatpush1.bf16.msra.mxu0 %v1334_v16  ;;  %1086 = vmatprep.mubr.f32.mxu0 %v1470_v1  ;;  %v1342_v1 = vpack.c.bf16 %v917_v24, %v915_v28 }
 0x39d   :  { %1337 = vmatprep.subr.bf16.mxu0 %v1336_v18 }
 0x3a0   :  { %1339 = vmatpush1.bf16.msra.mxu0 %v1338_v22 }
 0x3a1   :  { %1341 = vmatprep.subr.bf16.mxu0 %v1340_v23 }
 0x3a4   :  { %1343 = vmatpush1.bf16.msra.mxu0 %v1342_v1 }
 0x3a5   :  { %1345 = vmatprep.subr.bf16.mxu0 %v1344_v29 }
 0x3a8   :  { %1347 = vmatpush1.bf16.msra.mxu0 %v1346_v33 }
 0x3a9   :  { %1349 = vmatprep.subr.bf16.mxu0 %v1348_v34 }
 0x3ac   :  { %1351 = vmatpush1.bf16.msra.mxu0 %v1350_v40 }
 0x3ad   :  { %v730_v49 = vpop.f32.mrb[24].mxu1  ;;  %1353 = vmatprep.subr.bf16.mxu0 %v1352_v41 }
 0x3ae   :  { %v731_v53 = vadd.f32 %v730_v49, %v1955_v57  ;;  %v1266_v54 = vpop.f32.mrb[25].mxu1  ;;  %v935_v57 = vld [vmem:[%s2077_s6 + $0x2e0] sm:$0xff] }
 0x3af   :  { %v733_v56 = vpop.f32.mrb[26].mxu1  ;;  %v1362_v6 = vpack.c.bf16 %v937_v62, %v935_v57 }
 0x3b0   :  { %v755_v58 = vadd.f32 %v749_v47, %v731_v53  ;;  %v1267_v59 = vpop.f32.mrb[27].mxu1  ;;  %1355 = vmatpush1.bf16.msra.mxu0 %v1354_v48 }
 0x3b1   :  { %1357 = vmatprep.subr.bf16.mxu0 %v1356_v50 }
 0x3b2   :  { %v758_v4 = vmax.f32 %v755_v58, 0.0 }
 0x3b4   :  { %v762_v5 = vadd.f32 %v1951_v15, %v758_v4  ;;  %1359 = vmatpush1.bf16.msra.mxu0 %v1358_v60 }
 0x3b5   :  { %1361 = vmatprep.subr.bf16.mxu0 %v1360_v61 }
 0x3b6   :  { %v783_v7 = vrot.slane %v762_v5, 4  ;;  %v794_v8 = vmul.f32 %v762_v5, %v762_v5  ;;  %v833_v24 = vpack.c.bf16 %v762_v5, %v762_v5 }
 0x3b8   :  { %v784_v9 = vadd.f32 %v783_v7, %v762_v5  ;;  %v807_v10 = vrot.slane %v794_v8, 4  ;;  %1363 = vmatpush1.bf16.msra.mxu0 %v1362_v6  ;;  %v836_v25 = vunpack.c.l.bf16 %v833_v24 }
 0x3ba   :  { %v785_v11 = vrot.slane %v784_v9, 2  ;;  %v808_v12 = vadd.f32 %v807_v10, %v794_v8 }
 0x3bc   :  { %v809_v13 = vrot.slane %v808_v12, 2  ;;  %v786_v14 = vadd.f32 %v785_v11, %v784_v9 }
 0x3be   :  { %v810_v16 = vadd.f32 %v809_v13, %v808_v12  ;;  %v787_v17 = vrot.slane %v786_v14, 1 }
 0x3c0   :  { %v811_v18 = vrot.slane %v810_v16, 1  ;;  %v788_v19 = vadd.f32 %v787_v17, %v786_v14 }
 0x3c2   :  { %v791_v20 = vmul.f32 0.125, %v788_v19  ;;  %v812_v21 = vadd.f32 %v811_v18, %v810_v16 }
 0x3c4   :  { %v815_v27 = vmul.f32 0.125, %v812_v21  ;;  %v818_v15 = vmul.f32 %v791_v20, %v791_v20  ;;  %v839_v26 = vsub.f32 %v836_v25, %v791_v20 }
 0x3c6   :  { %v821_v22 = vsub.f32 %v815_v27, %v818_v15 }
 0x3c8   :  { %v824_v23 = vmax.f32 %v821_v22, 0.0 }
 0x3ca   :  { %v827_v28 = vadd.f32 1e-05, %v824_v23 }
 0x3cc   :  { %1444 = vrsqrt.f32 %v827_v28 }
 0x3d6   :  { %v1445_v1 = vpop.eup %1444 }
 0x3d7   :  { %v842_v29 = vmul.f32 %v1445_v1, %v839_v26 }
 0x3d9   :  { %1087 = vmatmul.mubr.f32.vlgmr.msra.gmra.mrb[4].mxu0 %v842_v29 }
 0x4ac   :  { %v1088_v32 = vpop.f32.mrb[4].mxu0 }
 0x4ad   :  { %v1364_v33 = vadd.f32 %v1088_v32, %v944_v31  ;;  %v1090_v34 = vpop.f32.mrb[5].mxu0 }
 0x4ae   :  { %v1365_v35 = vadd.f32 %v1090_v34, %v948_v42 }
 0x4af   :  { %vm1093_vm4 = vcmp.gt.f32.partialorder %v1364_v33, 0.0  ;;  %v1095_v36 = vmul.f32 0.01, %v1364_v33 }
 0x4b0   :  { %vm1094_vm5 = vcmp.gt.f32.partialorder %v1365_v35, 0.0  ;;  %v1096_v37 = vmul.f32 0.01, %v1365_v35 }
 0x4b1   :  { %v1097_v38 = vsel %vm1093_vm4, %v1364_v33, %v1095_v36 }
 0x4b2   :  { %v1098_v39 = vsel %vm1094_vm5, %v1365_v35, %v1096_v37  ;;  %1099 = vst [vmem:[#allocation2] sm:$0xff] %v1097_v38 }
 0x4b3   :  { %1100 = vst [vmem:[#allocation2 + $0x8] sm:$0xff] %v1098_v39 }
 0x4b4   :  { %1457 = shalt.err (!%p1454_p4)
}
 0x4b5   :  { %s1458_s18 = scalar_lea.hbm %s2079_s8, 256 }
 0x4b6   :  { %p1459_p5 = scmp.ne.s32.totalorder %s2079_s8, %s1458_s18  ;;  %p1462_p6 = scmp.lt.u32.totalorder %s1458_s18, %s2079_s8 }
 0x4b8   :  { %p1464_p7 = pnand %p1462_p6, %p1459_p5 }
 0x4ba   :  { %1467 = shalt.err (!%p1464_p7)
}
 0x4bb   :  { %1110 = dma.vmem_to_hbm [thread:$0]  %s1108_s15, 256, %s2079_s8, [#allocation3]  }
 0x4bc   :  { %1468 = dma.done.wait [#allocation3], 256  }
 0x4bd   :  { %1469 = vsyncadd [#allocation3], 4294967040 }
 0x4be   :  { %1114 = vsyncpa [#allocation3], 1 }

</bundles_post_ra>
